<compile_context>
chip_gen: v6e
topology: v6e:2x2x1
jax: 0.10.0
libtpu: 0.0.40
codegen_flags: <defaults>
</compile_context>

<pallas_src>
import jax
import jax.numpy as jnp
from jax.experimental import pallas as pl
from jax.experimental.pallas import tpu as pltpu

_LANE = 128
_VMEM_LIMIT = 48 * 1024 * 1024  # safe on v5e/v6e (128 MiB phys) and v7x (64 MiB)


def _round_up(x, m):
    return (x + m - 1) // m * m


def _sublane(dtype):
    itemsize = jnp.dtype(dtype).itemsize
    return {4: 8, 2: 16, 1: 32}.get(itemsize, 8)


def _pick_tk(h_pad, w_bytes, budget_bytes):
    """Largest multiple of 128 that divides h_pad with tk*h_pad*w_bytes <= budget."""
    best = _LANE
    cand = _LANE
    while cand <= h_pad:
        if h_pad % cand == 0 and cand * h_pad * w_bytes <= budget_bytes:
            best = cand
        cand += _LANE
    return best


# ---------------------------------------------------------------------------
# Kernels
# ---------------------------------------------------------------------------

def _residual_linear_kernel(x_ref, w_ref, b_ref, o_ref):
    """Resident-weight path.  x_ref:(TM,H) w_ref:(H,H) b_ref:(1,H) o_ref:(TM,H)."""
    x = x_ref[...]                                            # original precision
    y = jnp.dot(x.astype(w_ref.dtype), w_ref[...],
                preferred_element_type=jnp.float32)           # MXU, f32 accumulate
    y = y + b_ref[...]                                        # bias (f32)
    y = y + x.astype(jnp.float32)                             # residual, un-quantized x
    o_ref[...] = y.astype(o_ref.dtype)


def _residual_linear_ktiled_kernel(x_mm_ref, x_res_ref, w_ref, b_ref, o_ref, acc_ref):
    """K-tiled path.  x_mm:(TM,TK) x_res:(TM,H) w:(TK,H) b:(1,H) o:(TM,H) acc:(TM,H)f32."""
    k = pl.program_id(1)

    @pl.when(k == 0)
    def _():
        acc_ref[...] = jnp.zeros_like(acc_ref)

    acc_ref[...] += jnp.dot(x_mm_ref[...].astype(w_ref.dtype), w_ref[...],
                            preferred_element_type=jnp.float32)

    @pl.when(k == pl.num_programs(1) - 1)
    def _():
        y = acc_ref[...] + b_ref[...]                         # bias (f32)
        y = y + x_res_ref[...].astype(jnp.float32)            # residual, un-quantized x
        o_ref[...] = y.astype(o_ref.dtype)


# ---------------------------------------------------------------------------
# Wrappers
# ---------------------------------------------------------------------------

def prepare_residual_linear_params(w, b, *, compute_dtype=jnp.bfloat16):
    """One-time parameter prep (do at init, not per forward call).

    Casts W to the MXU compute dtype (default bf16; pass None to keep f32),
    keeps the bias in f32, and pads the hidden dim up to a lane multiple only
    when needed (hidden % 128 != 0).
    """
    hidden = w.shape[0]
    assert w.shape == (hidden, hidden)
    assert b.shape == (hidden,)
    h_pad = _round_up(max(hidden, _LANE), _LANE)
    w_p = w if compute_dtype is None else w.astype(compute_dtype)
    b_p = b.astype(jnp.float32).reshape(1, hidden)
    if h_pad != hidden:
        w_p = jnp.pad(w_p, ((0, h_pad - hidden), (0, h_pad - hidden)))
        b_p = jnp.pad(b_p, ((0, 0), (0, h_pad - hidden)))
    return w_p, b_p


def residual_add_linear(x, w_prepared, b_prepared, *, tm=256,
                        w_resident_budget_bytes=4 * 1024 * 1024,
                        k_tile_budget_bytes=2 * 1024 * 1024):
    """out = (x @ W + b) + x fused in a single Pallas kernel.

    x: (..., hidden) in the model's working dtype (f32 or bf16; output keeps it).
    w_prepared, b_prepared: from prepare_residual_linear_params (hoisted prep).
    """
    orig_shape = x.shape
    hidden = orig_shape[-1]
    h_pad = w_prepared.shape[0]
    assert w_prepared.shape == (h_pad, h_pad)
    assert b_prepared.shape == (1, h_pad)
    out_dtype = x.dtype
    w_bytes = jnp.dtype(w_prepared.dtype).itemsize
    x_bytes = jnp.dtype(x.dtype).itemsize
    o_bytes = jnp.dtype(out_dtype).itemsize

    m = 1
    for d in orig_shape[:-1]:
        m *= d
    x2d = x.reshape(m, hidden)
    if h_pad != hidden:
        # Atypical hidden (not a multiple of 128): pad lanes with zeros so the
        # contraction dim is well-defined and stores stay lane-dense.
        x2d = jnp.pad(x2d, ((0, 0), (0, h_pad - hidden)))

    # Row tile aligned to the sublane packing unit of the activation dtype.
    sub = _sublane(x.dtype)
    tm = min(tm, _round_up(m, sub))
    tm = max(sub, _round_up(tm, sub))
    if m <= tm and m > sub:
        # Keep at least two row tiles so both v7x TensorCores get work.
        tm = _round_up(pl.cdiv(m, 2), sub)
    num_m = pl.cdiv(m, tm)

    cost = pl.CostEstimate(
        flops=2 * m * hidden * hidden + 2 * m * hidden,
        transcendentals=0,
        bytes_accessed=m * hidden * (x_bytes + o_bytes)
                       + hidden * hidden * w_bytes + hidden * 4)

    if h_pad * h_pad * w_bytes <= w_resident_budget_bytes:
        # --- resident-weight path: W + bias stay in VMEM across all row tiles.
        out2d = pl.pallas_call(
            _residual_linear_kernel,
            out_shape=jax.ShapeDtypeStruct((m, h_pad), out_dtype),
            grid_spec=pltpu.PrefetchScalarGridSpec(
                num_scalar_prefetch=0,
                grid=(num_m,),
                in_specs=[
                    pl.BlockSpec((tm, h_pad), lambda i: (i, 0)),      # activations
                    pl.BlockSpec((h_pad, h_pad), lambda i: (0, 0)),   # weight (resident)
                    pl.BlockSpec((1, h_pad), lambda i: (0, 0)),       # bias (resident)
                ],
                out_specs=pl.BlockSpec((tm, h_pad), lambda i: (i, 0)),
            ),
            compiler_params=pltpu.CompilerParams(
                dimension_semantics=("parallel",),
                vmem_limit_bytes=_VMEM_LIMIT),
            cost_estimate=cost,
        )(x2d, w_prepared, b_prepared)
    else:
        # --- K-tiled path for large hidden: bounded per-step VMEM, f32 accumulator.
        tk = _pick_tk(h_pad, w_bytes, k_tile_budget_bytes)
        num_k = h_pad // tk
        out2d = pl.pallas_call(
            _residual_linear_ktiled_kernel,
            out_shape=jax.ShapeDtypeStruct((m, h_pad), out_dtype),
            grid_spec=pltpu.PrefetchScalarGridSpec(
                num_scalar_prefetch=0,
                grid=(num_m, num_k),
                in_specs=[
                    pl.BlockSpec((tm, tk), lambda i, k: (i, k)),      # x K-chunk (matmul)
                    pl.BlockSpec((tm, h_pad), lambda i, k: (i, 0)),   # x full row (residual)
                    pl.BlockSpec((tk, h_pad), lambda i, k: (k, 0)),   # weight K-slab
                    pl.BlockSpec((1, h_pad), lambda i, k: (0, 0)),    # bias
                ],
                out_specs=pl.BlockSpec((tm, h_pad), lambda i, k: (i, 0)),
                scratch_shapes=[pltpu.VMEM((tm, h_pad), jnp.float32)],
            ),
            compiler_params=pltpu.CompilerParams(
                dimension_semantics=("parallel", "arbitrary"),
                vmem_limit_bytes=_VMEM_LIMIT),
            cost_estimate=cost,
        )(x2d, x2d, w_prepared, b_prepared)

    if h_pad != hidden:
        out2d = out2d[:, :hidden]
    return out2d.reshape(orig_shape)


# ---------------------------------------------------------------------------
# Demo / self-test
# ---------------------------------------------------------------------------

if __name__ == "__main__":
    key = jax.random.PRNGKey(0)
    kx, kw, kb, kx2, kw2, kb2 = jax.random.split(key, 6)

    # --- Test 1: ViT-wrapper shapes, resident-weight path ---------------------
    batch, seq, hidden = 2, 8, 32
    x = jax.random.normal(kx, (batch, seq, hidden), dtype=jnp.float32)
    w = jax.random.normal(kw, (hidden, hidden), dtype=jnp.float32) * 0.02
    b = jax.random.normal(kb, (hidden,), dtype=jnp.float32) * 0.02
    ref = (x @ w + b) + x

    # Exact f32 path (compute_dtype=None).
    w_f32, b_f32 = prepare_residual_linear_params(w, b, compute_dtype=None)
    out = residual_add_linear(x, w_f32, b_f32)
    jax.block_until_ready(out)
    assert out.shape == x.shape and out.dtype == x.dtype
    assert jnp.allclose(out, ref, atol=1e-5, rtol=1e-5), "f32 mismatch vs reference"

    # Default bf16-MXU path (params prepared once; residual/bias stay full precision).
    w_bf, b_bf = prepare_residual_linear_params(w, b)
    out_bf = residual_add_linear(x, w_bf, b_bf)
    jax.block_until_ready(out_bf)
    assert out_bf.shape == x.shape and out_bf.dtype == x.dtype
    assert jnp.allclose(out_bf, ref, atol=5e-2, rtol=5e-2), "bf16 mismatch vs reference"

    # --- Test 2: forced K-tiled accumulator path with a ragged last row tile --
    batch2, seq2, hidden2 = 2, 9, 256
    x2 = jax.random.normal(kx2, (batch2, seq2, hidden2), dtype=jnp.float32)
    w2 = jax.random.normal(kw2, (hidden2, hidden2), dtype=jnp.float32) * 0.02
    b2 = jax.random.normal(kb2, (hidden2,), dtype=jnp.float32) * 0.02
    ref2 = (x2 @ w2 + b2) + x2
    w2p, b2p = prepare_residual_linear_params(w2, b2)
    out2 = residual_add_linear(
        x2, w2p, b2p,
        w_resident_budget_bytes=0,            # force the K-tiled path
        k_tile_budget_bytes=128 * 256 * 2)    # -> tk=128, two K steps
    jax.block_until_ready(out2)
    assert out2.shape == x2.shape and out2.dtype == x2.dtype
    assert jnp.allclose(out2, ref2, atol=5e-2, rtol=5e-2), "K-tiled mismatch vs reference"

    print("KERNEL_OK")
</pallas_src>

<mosaic_0001>
module attributes {stable_mosaic.version = 11 : i64} {
  func.func @_residual_linear_kernel(%arg0: i32, %arg1: memref<8x128xf32, #tpu.memory_space<vmem>>, %arg2: memref<128x128xf32, #tpu.memory_space<vmem>>, %arg3: memref<1x128xf32, #tpu.memory_space<vmem>>, %arg4: memref<8x128xf32, #tpu.memory_space<vmem>>) attributes {dimension_semantics = [#tpu.dimension_semantics<parallel>], iteration_bounds = array<i64: 2>, scalar_prefetch = 0 : i64, scratch_operands = 0 : i64, tpu.core_type = #tpu.core_type<tc>, window_params = [{transform_indices = @transform_0, window_bounds = array<i64: 8, 128>}, {pipeline_mode = #tpu.pipeline_mode<synchronous>, transform_indices = @transform_1, window_bounds = array<i64: 128, 128>}, {pipeline_mode = #tpu.pipeline_mode<synchronous>, transform_indices = @transform_2, window_bounds = array<i64: 1, 128>}, {transform_indices = @transform_3, window_bounds = array<i64: 8, 128>}]} {
    %c0 = arith.constant 0 : index
    %c0_0 = arith.constant 0 : index
    %0 = vector.load %arg1[%c0, %c0_0] : memref<8x128xf32, #tpu.memory_space<vmem>>, vector<8x128xf32>
    %c0_1 = arith.constant 0 : index
    %c0_2 = arith.constant 0 : index
    %1 = vector.load %arg2[%c0_1, %c0_2] : memref<128x128xf32, #tpu.memory_space<vmem>>, vector<128x128xf32>
    %cst = arith.constant dense<0.000000e+00> : vector<8x128xf32>
    %2 = tpu.matmul %0, %1, %cst {dimension_numbers = #tpu.dot_dimension_numbers<[1], [0], [0], [1], [0, 0, 1, 1], [], []>} : vector<8x128xf32>, vector<128x128xf32>, vector<8x128xf32> -> vector<8x128xf32>
    %c0_3 = arith.constant 0 : index
    %c0_4 = arith.constant 0 : index
    %3 = vector.load %arg3[%c0_3, %c0_4] : memref<1x128xf32, #tpu.memory_space<vmem>>, vector<1x128xf32>
    %4 = vector.broadcast %3 : vector<1x128xf32> to vector<8x128xf32>
    %5 = arith.addf %2, %4 : vector<8x128xf32>
    %6 = arith.addf %5, %0 : vector<8x128xf32>
    %c0_5 = arith.constant 0 : index
    %c0_6 = arith.constant 0 : index
    %7 = vector.load %arg4[%c0_5, %c0_6] : memref<8x128xf32, #tpu.memory_space<vmem>>, vector<8x128xf32>
    tpu.vector_store %arg4[%c0_5, %c0_6], %6 {strides = array<i32>} : memref<8x128xf32, #tpu.memory_space<vmem>>, vector<8x128xf32>,
    return
  }
  func.func @transform_0(%arg0: i32) -> (i32, i32) {
    %c0_i32 = arith.constant 0 : i32
    %c0_i32_0 = arith.constant 0 : i32
    return %arg0, %c0_i32 : i32, i32
  }
  func.func @transform_1(%arg0: i32) -> (i32, i32) {
    %c0_i32 = arith.constant 0 : i32
    %c0_i32_0 = arith.constant 0 : i32
    %c0_i32_1 = arith.constant 0 : i32
    return %c0_i32, %c0_i32_0 : i32, i32
  }
  func.func @transform_2(%arg0: i32) -> (i32, i32) {
    %c0_i32 = arith.constant 0 : i32
    %c0_i32_0 = arith.constant 0 : i32
    %c0_i32_1 = arith.constant 0 : i32
    return %c0_i32, %c0_i32_0 : i32, i32
  }
  func.func @transform_3(%arg0: i32) -> (i32, i32) {
    %c0_i32 = arith.constant 0 : i32
    %c0_i32_0 = arith.constant 0 : i32
    return %arg0, %c0_i32 : i32, i32
  }
}

</mosaic_0001>

<bundles_post_ra>
// kernel: tpu_custom_call.1
= control target key start
LH: loop header
LB: loop body
LE: loop exit
PB: predicated region body
PF: predicated region fallthrough
CT: control target
= control target key end

     0   :  { %8 = vsyncpa [#allocation3], 0  ;;  %s834_s0 = inlined_call_operand.hbm [shape: f32[16,128], index: 0, kind: input, shape index: {}]   ;;  %s835_s1 = inlined_call_operand.hbm [shape: f32[128,128], index: 1, kind: input, shape index: {}]   ;;  %s836_s2 = inlined_call_operand.vmem [shape: f32[1,128], index: 2, kind: input, shape index: {}]   ;;  %s837_s3 = inlined_call_operand.hbm [shape: f32[16,128], index: 3, kind: output, shape index: {}]  }
   0x1   :  { %10 = vsyncpa [#allocation3 + $0x1], 0 }
   0x2   :  { %11 = vsyncpa [#allocation6], 0 }
   0x3   :  { %12 = vsyncpa [#allocation4], 0 }
   0x4   :  { %14 = vsyncpa [#allocation4 + $0x1], 0  ;;  %s670_s12 = smov 0   ;;  %s672_s13 = smov 0  }
   0x5   :  { %s674_s14 = smov 0   ;;  %s676_s15 = smov 0  }
   0x6 LB: > { %s691_s16 = sadd.s32 4294967295, %s641_s15   ;;  %s391_s17 = sadd.s32 4294967294, %s641_s15   ;;  %s641_s15 = sphi %s676_s15, %s859_s15   ;;  %s637_s14 = sphi %s674_s14, %s858_s14   ;;  %s633_s13 = sphi %s672_s13, %s857_s13   ;;  %s629_s12 = sphi %s670_s12, %s856_s12  }
   0x7   : > { %p40_p0 = scmp.ne.s32.totalorder %s633_s13, %s629_s12  ;;  %p838_p1 = scmp.eq.s32.totalorder %s691_s16, 0 }
   0x8   : > { %p112_p3 = scmp.eq.s32.totalorder %s391_s17, 1  ;;  %p392_p5 = scmp.ge.s32.totalorder %s641_s15, 1 }
   0x9   : > { %p700_p4 = por %p838_p1, %p40_p0  ;;  %p119_p7 = scmp.lt.s32.totalorder %s641_s15, 3 }
   0xa   : > { %p705_p6 = por %p112_p3, %p40_p0  ;;  %s643_s21 = smov [#allocation5]  }
   0xb   : > { %s842_s18 = scalar_select %p700_p4, 1, 0 }
   0xc   : > { %s843_s19 = scalar_select %p705_p6, 1, 0 }
   0xd   : > { %p710_p8 = pnand %p392_p5, %p119_p7  ;;  %s131_s22 = sshll.u32 %s643_s21, 4  ;;  %s132_s22 = int_to_ptr.vmem [resolvable:$true] %s131_s22 }
   0xe   : > { %s724_s24 = sadd.s32 1, %s641_s15   ;;  %s27_s25 = sadd.s32 1, %s637_s14 }
   0xf   : > { %s844_s20 = scalar_select %p710_p8, 1, 0 }
  0x10   : > { %p466_p9 = pneg %p710_p8  ;;  %s24_s26 = ssub.s32 %s641_s15, %s724_s24 }
  0x11   : > { %s530_s27 = scalar_lea.vmem %s132_s22, 2048  ;;  %p538_p5 = scmp.lt.s32.totalorder %s132_s22, %s132_s22 }
  0x12   : > { %p719_p11 = pnand %p466_p9, %p838_p1  ;;  %p531_p13 = scmp.ne.s32.totalorder %s132_s22, %s530_s27 }
  0x13   : > { %p539_p7 = scmp.lt.s32.totalorder %s530_s27, %s530_s27 }
  0x14   : > { %p521_p12 = pneg %p719_p11 }
  0x15   : > { %p540_p10 = por %p539_p7, %p538_p5 }
  0x16   : > { %p533_p0 = pnand %p531_p13, %p521_p12 }
  0x18   : > { %p534_p3 = pneg %p533_p0 }
  0x1a   : > { %p541_p2 = pnand %p540_p10, %p534_p3 }
  0x1c   : > { %544 = shalt.err (!%p541_p2)
}
  0x1d   : > { %s644_s28 = smov 128   ;;  %s645_s29 = smov 8  }
  0x1e   : > { %469 = dma.hbm_to_vmem [thread:$0]  (!%p719_p11), %s835_s1, 2048, %s132_s22, [#allocation6], %s644_s28, %s644_s28, %s645_s29  }
  0x1f   : > { %p25_p9 = scmp.eq.s32.totalorder %s24_s26, 0  ;;  %p34_p12 = scmp.ne.s32.totalorder %s637_s14, %s633_s13 }
  0x20   : > { %p35_p10 = scmp.eq.s32.totalorder %s641_s15, 0  ;;  %p479_p2 = scmp.lt.s32.totalorder %s641_s15, 2 }
  0x21   : > { %s741_s5 = scalar_select %p25_p9, %s637_s14, %s27_s25  }
  0x22   : > { %p36_p13 = por %p35_p10, %p34_p12  ;;  %p846_p0 = scmp.eq.s32.totalorder %s691_s16, 1 }
  0x23   : > { %s148_s7 = sand.u32 1, %s637_s14   ;;  %s396_s8 = sshll.u32 %s641_s15, 7 }
  0x24   : > { %p745_p3 = por %p846_p0, %p34_p12  ;;  %s395_s9 = sshll.u32 %s148_s7, 3 }
  0x25   : > { %s754_s17 = scalar_lea.hbm %s834_s0, %s396_s8  ;;  %s152_s21 = scalar_lea.vmem [#allocation2], %s395_s9 }
  0x26   : > { %s847_s6 = scalar_select %p745_p3, 1, 0 }
  0x27   : > { %s159_s22 = sshll.u32 %s152_s21, 4  ;;  %p756_p11 = pnand %p479_p2, %p36_p13  ;;  %s160_s22 = int_to_ptr.vmem [resolvable:$true] %s159_s22 }
  0x28   : > { %s149_s25 = scalar_lea.sflag [#allocation3], %s148_s7  ;;  %s545_s26 = scalar_lea.hbm %s754_s17, 128 }
  0x29   : > { %p546_p5 = scmp.ne.s32.totalorder %s754_s17, %s545_s26  ;;  %p547_p7 = pneg %p756_p11 }
  0x2a   : > { %s550_s29 = scalar_lea.hbm %s834_s0, 256  ;;  %p551_p10 = scmp.lt.s32.totalorder %s754_s17, %s834_s0 }
  0x2b   : > { %p548_p9 = pnand %p547_p7, %p546_p5  ;;  %p552_p2 = scmp.lt.s32.totalorder %s550_s29, %s545_s26 }
  0x2d   : > { %p549_p12 = pneg %p548_p9  ;;  %p553_p13 = por %p552_p2, %p551_p10 }
  0x2f   : > { %p554_p0 = pnand %p553_p13, %p549_p12 }
  0x31   : > { %557 = shalt.err (!%p554_p0)
}
  0x32   : > { %s558_s8 = scalar_lea.vmem %s160_s22, 128  ;;  %s646_s7 = smov [#allocation2]  }
  0x33   : > { %p559_p1 = scmp.ne.s32.totalorder %s160_s22, %s558_s8  ;;  %s563_s9 = sshll.u32 %s646_s7, 4  ;;  %s564_s9 = int_to_ptr.vmem [resolvable:$false] %s563_s9 }
  0x34   : > { %s565_s10 = scalar_lea.vmem %s564_s9, 256  ;;  %p566_p5 = scmp.lt.s32.totalorder %s160_s22, %s564_s9 }
  0x35   : > { %p561_p6 = pnand %p559_p1, %p547_p7  ;;  %p567_p9 = scmp.lt.s32.totalorder %s565_s10, %s558_s8 }
  0x37   : > { %p562_p3 = pneg %p561_p6  ;;  %p568_p4 = por %p567_p9, %p566_p5 }
  0x39   : > { %p569_p8 = pnand %p568_p4, %p562_p3 }
  0x3b   : > { %572 = shalt.err (!%p569_p8)
}
  0x3c   : > { %473 = dma.hbm_to_vmem [thread:$0]  (!%p756_p11), %s754_s17, 128, %s160_s22, %s149_s25  }
  0x3d   : > { %p849_p12 = scmp.ne.s32.totalorder %s844_s20, 0 }
  0x3e   : > { %s777_s11 = sand.u32 (!%p849_p12), 1, %s633_s13   ;;  %p850_p1 = scmp.ne.s32.totalorder (!%p849_p12), %s842_s18, 0 }
  0x3f   : > { %168 = sbr.rel (%p849_p12) target bundleno = 315 (0x13b), region = 32  ;;  %s398_s21 = sshll.u32 (!%p849_p12), %s777_s11, 3 }
  0x40   : > { %s171_s26 = scalar_lea.sflag (!%p849_p12), [#allocation3], %s777_s11  ;;  %s783_s27 = scalar_lea.vmem (!%p849_p12), [#allocation2], %s398_s21 }
  0x44   : > { %616 = dma.done.wait (%p850_p1), %s171_s26, 128  }
  0x45   : > { %618 = vsyncadd (%p850_p1), %s171_s26, 4294967168  ;;  %p851_p4 = scmp.eq.s32.totalorder %s691_s16, 0 }
  0x47   : > { %620 = dma.done.wait (%p851_p4), [#allocation6], 2048   ;;  %p852_p6 = pmov %p851_p4 }
  0x48   : > { %v647_v0 = vmov 0.0   ;;  %vm648_vm0 = vmmov 0   ;;  %v217_v1 = vld [vmem:[#allocation5 + $0x78] sm:$0xff]  ;;  %v216_v2 = vld [vmem:[#allocation5 + $0x70] sm:$0xff]  ;;  %v215_v3 = vld [vmem:[#allocation5 + $0x68] sm:$0xff]  ;;  %s403_s17 = sshll.u32 %s691_s16, 7 }
  0x49   : > { %622 = vsyncadd (%p852_p6), [#allocation6], 4294965248  ;;  %423 = vmatprep.subr.mxu0 %v647_v0  ;;  %455 = vmatprep.mubr.msk.f32.mxu0 %vm648_vm0, %v647_v0  ;;  %v214_v4 = vld [vmem:[#allocation5 + $0x60] sm:$0xff]  ;;  %v213_v5 = vld [vmem:[#allocation5 + $0x58] sm:$0xff]  ;;  %s200_s22 = scalar_lea.vmem [#allocation7], %s398_s21  ;;  %s309_s29 = scalar_lea.hbm %s837_s3, %s403_s17 }
  0x4a   : > { %424 = vmatpush3.msra.mxu0 %v217_v1  ;;  %v212_v6 = vld [vmem:[#allocation5 + $0x50] sm:$0xff]  ;;  %v211_v7 = vld [vmem:[#allocation5 + $0x48] sm:$0xff]  ;;  %v210_v8 = vld [vmem:[#allocation5 + $0x40] sm:$0xff]  ;;  %s311_s23 = sshll.u32 %s200_s22, 4  ;;  %s298_s30 = scalar_lea.sflag [#allocation4], %s777_s11  ;;  %s312_s23 = int_to_ptr.vmem [resolvable:$true] %s311_s23 }
  0x4b   : > { %425 = vmatprep.subr.mxu0 %v647_v0  ;;  %v209_v9 = vld [vmem:[#allocation5 + $0x38] sm:$0xff]  ;;  %v208_v10 = vld [vmem:[#allocation5 + $0x30] sm:$0xff]  ;;  %v207_v11 = vld [vmem:[#allocation5 + $0x28] sm:$0xff]  ;;  %s573_s4 = scalar_lea.vmem %s312_s23, 128  ;;  %p853_p3 = scmp.ne.s32.totalorder %s847_s6, 0 }
  0x4c   : > { %426 = vmatpush3.msra.mxu0 %v216_v2  ;;  %v206_v12 = vld [vmem:[#allocation5 + $0x20] sm:$0xff]  ;;  %v205_v13 = vld [vmem:[#allocation5 + $0x18] sm:$0xff]  ;;  %v204_v14 = vld [vmem:[#allocation5 + $0x10] sm:$0xff]  ;;  %p574_p8 = scmp.ne.s32.totalorder %s312_s23, %s573_s4  ;;  %s649_s8 = smov [#allocation7]  }
  0x4d   : > { %427 = vmatprep.subr.mxu0 %v647_v0  ;;  %v203_v15 = vld [vmem:[#allocation5 + $0x8] sm:$0xff]  ;;  %v202_v16 = vld [vmem:[#allocation5] sm:$0xff]  ;;  %v201_v17 = vld [vmem:[%s783_s27] sm:$0xff]  ;;  %s577_s16 = sshll.u32 %s649_s8, 4  ;;  %s578_s16 = int_to_ptr.vmem [resolvable:$false] %s577_s16 }
  0x4e   : > { %428 = vmatpush3.msra.mxu0 %v215_v3  ;;  %v401_v18 = vld [vmem:[%s836_s2] ss:$0 sm:$0xff]  ;;  %p575_p11 = pnand %p574_p8, %p853_p3  ;;  %s579_s7 = scalar_lea.vmem %s578_s16, 256 }
  0x4f   : > { %429 = vmatprep.subr.mxu0 %v647_v0  ;;  %p580_p10 = scmp.lt.s32.totalorder %s312_s23, %s578_s16  ;;  %p581_p2 = scmp.lt.s32.totalorder %s579_s7, %s573_s4 }
  0x50   : > { %430 = vmatpush3.msra.mxu0 %v214_v4  ;;  %p576_p7 = pneg %p575_p11 }
  0x51   : > { %431 = vmatprep.subr.mxu0 %v647_v0  ;;  %p582_p13 = por %p581_p2, %p580_p10 }
  0x52   : > { %432 = vmatpush3.msra.mxu0 %v213_v5 }
  0x53   : > { %433 = vmatprep.subr.mxu0 %v647_v0  ;;  %p583_p0 = pnand %p582_p13, %p576_p7 }
  0x54   : > { %434 = vmatpush3.msra.mxu0 %v212_v6 }
  0x55   : > { %435 = vmatprep.subr.mxu0 %v647_v0 }
  0x56   : > { %436 = vmatpush3.msra.mxu0 %v211_v7 }
  0x57   : > { %437 = vmatprep.subr.mxu0 %v647_v0 }
  0x58   : > { %438 = vmatpush3.msra.mxu0 %v210_v8 }
  0x59   : > { %439 = vmatprep.subr.mxu0 %v647_v0 }
  0x5a   : > { %440 = vmatpush3.msra.mxu0 %v209_v9 }
  0x5b   : > { %441 = vmatprep.subr.mxu0 %v647_v0 }
  0x5c   : > { %442 = vmatpush3.msra.mxu0 %v208_v10 }
  0x5d   : > { %443 = vmatprep.subr.mxu0 %v647_v0 }
  0x5e   : > { %444 = vmatpush3.msra.mxu0 %v207_v11 }
  0x5f   : > { %445 = vmatprep.subr.mxu0 %v647_v0 }
  0x60   : > { %446 = vmatpush3.msra.mxu0 %v206_v12 }
  0x61   : > { %447 = vmatprep.subr.mxu0 %v647_v0 }
  0x62   : > { %448 = vmatpush3.msra.mxu0 %v205_v13 }
  0x63   : > { %449 = vmatprep.subr.mxu0 %v647_v0 }
  0x64   : > { %450 = vmatpush3.msra.mxu0 %v204_v14 }
  0x65   : > { %451 = vmatprep.subr.mxu0 %v647_v0 }
  0x66   : > { %452 = vmatpush3.msra.mxu0 %v203_v15 }
  0x67   : > { %453 = vmatprep.subr.mxu0 %v647_v0 }
  0x68   : > { %454 = vmatpush3.msra.mxu0 %v202_v16 }
  0x69   : > { %456 = vmatmul.mubr.f32.vlgmr.msra.gmra.mxu0 %v201_v17 }
 0x129   : > { %v291_v19 = vpop.f32.mrf.mxu0 }
 0x12a   : > { %v292_v20 = vadd.f32 %v401_v18, %v291_v19 }
 0x12b   : > { %v457_v21 = vpop.f32.mrf.mxu0 }
 0x12c   : > { %v295_v22 = vadd.f32 %v292_v20, %v201_v17 }
 0x12e   : > { %296 = vst [vmem:[%s200_s22] sm:$0xff] %v295_v22 }
 0x12f   : > { %586 = shalt.err (!%p583_p0)
}
 0x130   : > { %s587_s9 = scalar_lea.hbm %s309_s29, 128  ;;  %s591_s21 = scalar_lea.hbm %s837_s3, 256 }
 0x131   : > { %p588_p5 = scmp.ne.s32.totalorder %s309_s29, %s587_s9  ;;  %p592_p1 = scmp.lt.s32.totalorder %s309_s29, %s837_s3 }
 0x132   : > { %p593_p4 = scmp.lt.s32.totalorder %s591_s21, %s587_s9 }
 0x133   : > { %p589_p9 = pnand %p588_p5, %p853_p3 }
 0x134   : > { %p594_p6 = por %p593_p4, %p592_p1 }
 0x135   : > { %p590_p12 = pneg %p589_p9 }
 0x137   : > { %p595_p8 = pnand %p594_p6, %p590_p12 }
 0x139   : > { %598 = shalt.err (!%p595_p8)
}
 0x13a   : > { %464 = dma.vmem_to_hbm [thread:$0]  (%p853_p3), %s312_s23, 128, %s309_s29, %s298_s30  }
 0x13b PF: > { %s323_s18 = sand.u32 1, %s629_s12   ;;  %p854_p11 = scmp.ne.s32.totalorder %s843_s19, 0 }
 0x13c   : > { %p855_p7 = scmp.ge.s32.totalorder %s641_s15, 2  ;;  %s324_s20 = scalar_lea.sflag [#allocation4], %s323_s18 }
 0x13e   : > { %p475_p10 = pnand %p855_p7, %p854_p11 }
 0x140   : > { %p476_p2 = pneg %p475_p10 }
 0x142   : > { %624 = dma.done.wait (%p476_p2), %s324_s20, 128  }
 0x143   : > { %626 = vsyncadd (%p476_p2), %s324_s20, 4294967168  ;;  %p17_p13 = scmp.ge.s32.totalorder %s724_s24, 4   ;;  %s856_s12 = smov %s633_s13 }
 0x144   : > { %s857_s13 = smov %s637_s14  ;;  %s858_s14 = smov %s741_s5 }
 0x145   : > { %s859_s15 = smov %s724_s24  ;;  %19 = sbr.rel (!%p17_p13) target bundleno = 6 (0x6), region = 81 }
 0x14a   :  { %329 = vsyncpa [#allocation3], 1 }
 0x14b   :  { %331 = vsyncpa [#allocation3 + $0x1], 1 }
 0x14c   :  { %332 = vsyncpa [#allocation6], 1 }
 0x14d   :  { %333 = vsyncpa [#allocation4], 1 }
 0x14e   :  { %335 = vsyncpa [#allocation4 + $0x1], 1 }

</bundles_post_ra>
